<compile_context>
chip_gen: v6e
topology: v6e:2x2x1
jax: 0.10.0
libtpu: 0.0.40
codegen_flags: <defaults>
</compile_context>

<pallas_src>
import functools

import jax
import jax.numpy as jnp
from jax import lax
from jax.experimental import pallas as pl
from jax.experimental.pallas import tpu as pltpu

EPS = 1e-5
_MIB = 1024 * 1024


# ---------------------------------------------------------------------------
# Kernels
# ---------------------------------------------------------------------------

def _fused_kernel(x_ref, a_ref, w_ref, b_ref, o_ref):
    """Residual add + LayerNorm over the flattened (N*C) lane axis.

    One batch element per row of the (tb, N*C) slab; weight/bias are (1, N*C)
    and broadcast over rows.
    """
    inv_n = 1.0 / x_ref.shape[-1]

    def s():
        # Recompute the fp32 residual sum each pass instead of keeping one big
        # fp32 slab live across reduction + normalize: the VPU re-add is free
        # in this mem-bound regime and the shorter live range allows a larger
        # row block per grid step.
        return x_ref[...].astype(jnp.float32) + a_ref[...].astype(jnp.float32)

    mean = jnp.sum(s(), axis=-1, keepdims=True) * inv_n
    d = s() - mean
    var = jnp.sum(d * d, axis=-1, keepdims=True) * inv_n  # two-pass: no cancellation
    rstd = lax.rsqrt(var + EPS)

    w = w_ref[...].astype(jnp.float32)
    b = b_ref[...].astype(jnp.float32)
    o_ref[...] = ((s() - mean) * rstd * w + b).astype(o_ref.dtype)


def _stats_kernel(x_ref, a_ref, mean_ref, rstd_ref, sum_sc, sumsq_sc, *,
                  nc_total, chunk):
    """Pass 1 of the NC-tiled fallback: per-row sum / sum-of-squares -> mean, rstd."""
    j = pl.program_id(1)

    @pl.when(j == 0)
    def _():
        sum_sc[...] = jnp.zeros_like(sum_sc)
        sumsq_sc[...] = jnp.zeros_like(sumsq_sc)

    s = x_ref[...].astype(jnp.float32) + a_ref[...].astype(jnp.float32)
    if nc_total % chunk:  # last chunk is padded -> mask out-of-range lanes
        lane = j * chunk + lax.broadcasted_iota(jnp.int32, s.shape, dimension=1)
        s = jnp.where(lane < nc_total, s, 0.0)

    sum_sc[...] += jnp.sum(s, axis=-1, keepdims=True)
    sumsq_sc[...] += jnp.sum(s * s, axis=-1, keepdims=True)

    @pl.when(j == pl.num_programs(1) - 1)
    def _():
        inv_n = 1.0 / nc_total
        mean = sum_sc[...] * inv_n
        var = jnp.maximum(sumsq_sc[...] * inv_n - mean * mean, 0.0)
        mean_ref[...] = mean
        rstd_ref[...] = lax.rsqrt(var + EPS)


def _apply_kernel(x_ref, a_ref, w_ref, b_ref, mean_ref, rstd_ref, o_ref):
    """Pass 2 of the NC-tiled fallback: normalize + affine per NC chunk."""
    s = x_ref[...].astype(jnp.float32) + a_ref[...].astype(jnp.float32)
    w = w_ref[...].astype(jnp.float32)
    b = b_ref[...].astype(jnp.float32)
    o_ref[...] = ((s - mean_ref[...]) * rstd_ref[...] * w + b).astype(o_ref.dtype)


# ---------------------------------------------------------------------------
# VMEM accounting / tiling plan
# ---------------------------------------------------------------------------

def _vmem_limits():
    """(per-step budget, scoped vmem limit) derived from the chip generation."""
    try:
        cap = int(getattr(pltpu.get_tpu_info(), "vmem_capacity_bytes", 0)) or 64 * _MIB
    except Exception:
        cap = 64 * _MIB  # conservative: smallest physical VMEM (v7x)
    limit = min(64 * _MIB, cap // 2)            # v5e/v6e: 64 MiB, v7x: 32 MiB
    budget = min(24 * _MIB, (limit * 5) // 8)   # v5e/v6e: 24 MiB, v7x: 20 MiB
    return budget, limit


def _plan_rows(batch, nc, itemsize, w_itemsize, budget):
    """Largest valid row block for the fused path, or None if NC must be tiled.

    Per-step footprint model: double-buffered x/a/out slabs (2*3*tb*NC*itemsize)
    + fp32 working set (~2*tb*NC*4 for temporaries) + double-buffered
    weight/bias blocks (2*2*NC*w_itemsize) + slack.
    """
    per_row = nc * (6 * itemsize + 8)
    fixed = 4 * nc * w_itemsize + 256 * 1024
    min_tb = batch if batch < 8 else 8          # (8,128): rows must be x8 or == B
    max_rows = (budget - fixed) // per_row
    if max_rows < min_tb:
        return None                             # full-NC slab does not fit VMEM
    tb = batch if batch <= max_rows else max(8, (max_rows // 8) * 8)
    # Guarantee >= 2 grid steps when possible so "parallel" semantics can shard
    # the batch axis across both TensorCores (v7x / megacore).  Needs tb to stay
    # a multiple of 8, so only applicable once B >= 16.
    if batch >= 16:
        half8 = ((-(-batch // 2) + 7) // 8) * 8
        tb = min(tb, half8)
    return tb


def _plan_nc_chunk(tb, nc, itemsize, w_itemsize, budget):
    """Lane chunk (multiple of 128) for the NC-tiled fallback."""
    per_lane = tb * (6 * itemsize + 8) + 4 * w_itemsize
    max_lanes = max(128, (budget - 256 * 1024) // per_lane)
    chunk = max(128, (max_lanes // 128) * 128)
    nc128 = (nc // 128) * 128
    if nc128 >= 128:
        chunk = min(chunk, nc128)
    return chunk


# ---------------------------------------------------------------------------
# pallas_call wrappers
# ---------------------------------------------------------------------------

def _fused_call(x2, a2, w2, b2, tb, vmem_limit):
    B, NC = x2.shape
    itemsize = jnp.dtype(x2.dtype).itemsize
    w_itemsize = jnp.dtype(w2.dtype).itemsize
    grid = (pl.cdiv(B, tb),)
    cost = pl.CostEstimate(
        flops=9 * B * NC,
        transcendentals=B,
        bytes_accessed=3 * B * NC * itemsize + 2 * NC * w_itemsize,
    )
    grid_spec = pltpu.PrefetchScalarGridSpec(
        num_scalar_prefetch=0,
        grid=grid,
        in_specs=[
            pl.BlockSpec((tb, NC), lambda i: (i, 0)),
            pl.BlockSpec((tb, NC), lambda i: (i, 0)),
            # Constant block index -> DMA'd once, reused every grid step.
            pl.BlockSpec((1, NC), lambda i: (0, 0)),
            pl.BlockSpec((1, NC), lambda i: (0, 0)),
        ],
        out_specs=pl.BlockSpec((tb, NC), lambda i: (i, 0)),
    )
    return pl.pallas_call(
        _fused_kernel,
        out_shape=jax.ShapeDtypeStruct((B, NC), x2.dtype),
        grid_spec=grid_spec,
        compiler_params=pltpu.CompilerParams(
            dimension_semantics=("parallel",),
            vmem_limit_bytes=vmem_limit,
        ),
        cost_estimate=cost,
    )(x2, a2, w2, b2)


def _two_pass_call(x2, a2, w2, b2, tb, chunk, vmem_limit):
    """NC-tiled fallback for shapes where a (tb, N*C) slab cannot fit VMEM."""
    B, NC = x2.shape
    itemsize = jnp.dtype(x2.dtype).itemsize
    w_itemsize = jnp.dtype(w2.dtype).itemsize
    grid = (pl.cdiv(B, tb), pl.cdiv(NC, chunk))

    # Pass 1: per-row statistics (reduction axis last, "arbitrary").
    mean, rstd = pl.pallas_call(
        functools.partial(_stats_kernel, nc_total=NC, chunk=chunk),
        out_shape=(jax.ShapeDtypeStruct((B, 1), jnp.float32),
                   jax.ShapeDtypeStruct((B, 1), jnp.float32)),
        grid_spec=pltpu.PrefetchScalarGridSpec(
            num_scalar_prefetch=0,
            grid=grid,
            in_specs=[
                pl.BlockSpec((tb, chunk), lambda i, j: (i, j)),
                pl.BlockSpec((tb, chunk), lambda i, j: (i, j)),
            ],
            out_specs=(
                pl.BlockSpec((tb, 1), lambda i, j: (i, 0)),
                pl.BlockSpec((tb, 1), lambda i, j: (i, 0)),
            ),
            scratch_shapes=[pltpu.VMEM((tb, 1), jnp.float32),
                            pltpu.VMEM((tb, 1), jnp.float32)],
        ),
        compiler_params=pltpu.CompilerParams(
            dimension_semantics=("parallel", "arbitrary"),
            vmem_limit_bytes=vmem_limit,
        ),
        cost_estimate=pl.CostEstimate(
            flops=4 * B * NC,
            transcendentals=B,
            bytes_accessed=2 * B * NC * itemsize + 8 * B,
        ),
    )(x2, a2)

    # Pass 2: normalize + affine, fully parallel over (row block, NC chunk).
    out2 = pl.pallas_call(
        _apply_kernel,
        out_shape=jax.ShapeDtypeStruct((B, NC), x2.dtype),
        grid_spec=pltpu.PrefetchScalarGridSpec(
            num_scalar_prefetch=0,
            grid=grid,
            in_specs=[
                pl.BlockSpec((tb, chunk), lambda i, j: (i, j)),
                pl.BlockSpec((tb, chunk), lambda i, j: (i, j)),
                pl.BlockSpec((1, chunk), lambda i, j: (0, j)),
                pl.BlockSpec((1, chunk), lambda i, j: (0, j)),
                pl.BlockSpec((tb, 1), lambda i, j: (i, 0)),
                pl.BlockSpec((tb, 1), lambda i, j: (i, 0)),
            ],
            out_specs=pl.BlockSpec((tb, chunk), lambda i, j: (i, j)),
        ),
        compiler_params=pltpu.CompilerParams(
            dimension_semantics=("parallel", "parallel"),
            vmem_limit_bytes=vmem_limit,
        ),
        cost_estimate=pl.CostEstimate(
            flops=5 * B * NC,
            transcendentals=0,
            bytes_accessed=3 * B * NC * itemsize + 2 * NC * w_itemsize + 8 * B,
        ),
    )(x2, a2, w2, b2, mean, rstd)
    return out2


def normalized_layer(inputs, self_attention_output, weight, bias, *,
                     _force_two_pass=False, _force_nc_chunk=None):
    """inputs, self_attention_output: (B, N, C); weight, bias: (N, C)."""
    B, N, C = inputs.shape
    assert self_attention_output.shape == (B, N, C)
    assert weight.shape == (N, C) and bias.shape == (N, C)
    NC = N * C

    # Flatten to a lane-dense 2D layout: one row per batch element.
    x2 = inputs.reshape(B, NC)
    a2 = self_attention_output.reshape(B, NC)
    w2 = weight.reshape(1, NC)
    b2 = bias.reshape(1, NC)

    itemsize = jnp.dtype(inputs.dtype).itemsize
    w_itemsize = jnp.dtype(weight.dtype).itemsize
    budget, vmem_limit = _vmem_limits()

    tb = None if _force_two_pass else _plan_rows(B, NC, itemsize, w_itemsize, budget)
    if tb is not None:
        out2 = _fused_call(x2, a2, w2, b2, tb, vmem_limit)
    else:
        tb = B if B < 8 else 8
        chunk = _force_nc_chunk or _plan_nc_chunk(tb, NC, itemsize, w_itemsize, budget)
        out2 = _two_pass_call(x2, a2, w2, b2, tb, chunk, vmem_limit)

    # Dropout (p=0.1) is identity in eval/inference mode.
    # TODO(synk): training-mode dropout not implemented.
    return out2.reshape(B, N, C)


# ---------------------------------------------------------------------------
# Reference + self-test
# ---------------------------------------------------------------------------

def _reference(inputs, attn, weight, bias):
    s = (inputs + attn).astype(jnp.float32)
    mean = jnp.mean(s, axis=(1, 2), keepdims=True)
    var = jnp.mean((s - mean) ** 2, axis=(1, 2), keepdims=True)
    y = (s - mean) * lax.rsqrt(var + EPS)
    return (y * weight[None] + bias[None]).astype(inputs.dtype)


if __name__ == "__main__":
    B, N, C = 2, 8, 32  # batch, input_length, input_size

    key = jax.random.PRNGKey(0)
    k1, k2 = jax.random.split(key)
    inputs = jax.random.normal(k1, (B, N, C), dtype=jnp.float32)
    attn_out = jax.random.normal(k2, (B, N, C), dtype=jnp.float32)

    # PyTorch nn.LayerNorm default init: weight = ones, bias = zeros.
    weight = jnp.ones((N, C), dtype=jnp.float32)
    bias = jnp.zeros((N, C), dtype=jnp.float32)

    ref = _reference(inputs, attn_out, weight, bias)

    # Fused single-sweep path (used for normal shapes).
    out = jax.block_until_ready(normalized_layer(inputs, attn_out, weight, bias))
    assert out.shape == (B, N, C)
    assert jnp.allclose(out, ref, atol=1e-5, rtol=1e-5), "fused path mismatch vs reference"

    # NC-tiled two-pass fallback (used when N*C is too large for one slab);
    # force it here with a small chunk to verify correctness.
    out2 = jax.block_until_ready(
        normalized_layer(inputs, attn_out, weight, bias,
                         _force_two_pass=True, _force_nc_chunk=128))
    assert jnp.allclose(out2, ref, atol=2e-5, rtol=2e-5), "two-pass path mismatch vs reference"

    print("KERNEL_OK")
</pallas_src>

<mosaic_0001>
module attributes {stable_mosaic.version = 11 : i64} {
  func.func @_fused_kernel(%arg0: i32, %arg1: memref<2x256xf32, #tpu.memory_space<vmem>>, %arg2: memref<2x256xf32, #tpu.memory_space<vmem>>, %arg3: memref<1x256xf32, #tpu.memory_space<vmem>>, %arg4: memref<1x256xf32, #tpu.memory_space<vmem>>, %arg5: memref<2x256xf32, #tpu.memory_space<vmem>>) attributes {dimension_semantics = [#tpu.dimension_semantics<parallel>], iteration_bounds = array<i64: 1>, scalar_prefetch = 0 : i64, scratch_operands = 0 : i64, tpu.core_type = #tpu.core_type<tc>, window_params = [{transform_indices = @transform_0, window_bounds = array<i64: 2, 256>}, {transform_indices = @transform_1, window_bounds = array<i64: 2, 256>}, {pipeline_mode = #tpu.pipeline_mode<synchronous>, transform_indices = @transform_2, window_bounds = array<i64: 1, 256>}, {pipeline_mode = #tpu.pipeline_mode<synchronous>, transform_indices = @transform_3, window_bounds = array<i64: 1, 256>}, {transform_indices = @transform_4, window_bounds = array<i64: 2, 256>}]} {
    %c0 = arith.constant 0 : index
    %c0_0 = arith.constant 0 : index
    %0 = vector.load %arg1[%c0, %c0_0] : memref<2x256xf32, #tpu.memory_space<vmem>>, vector<2x256xf32>
    %c0_1 = arith.constant 0 : index
    %c0_2 = arith.constant 0 : index
    %1 = vector.load %arg2[%c0_1, %c0_2] : memref<2x256xf32, #tpu.memory_space<vmem>>, vector<2x256xf32>
    %2 = arith.addf %0, %1 : vector<2x256xf32>
    %cst = arith.constant dense<0.000000e+00> : vector<2xf32>
    %3 = vector.multi_reduction <add>, %2, %cst [1] : vector<2x256xf32> to vector<2xf32>
    %4 = vector.shape_cast %3 : vector<2xf32> to vector<2x1xf32>
    %cst_3 = arith.constant 3.906250e-03 : f32
    %5 = vector.broadcast %cst_3 : f32 to vector<2x1xf32>
    %6 = arith.mulf %4, %5 : vector<2x1xf32>
    %c0_4 = arith.constant 0 : index
    %c0_5 = arith.constant 0 : index
    %7 = vector.load %arg1[%c0_4, %c0_5] : memref<2x256xf32, #tpu.memory_space<vmem>>, vector<2x256xf32>
    %c0_6 = arith.constant 0 : index
    %c0_7 = arith.constant 0 : index
    %8 = vector.load %arg2[%c0_6, %c0_7] : memref<2x256xf32, #tpu.memory_space<vmem>>, vector<2x256xf32>
    %9 = arith.addf %7, %8 : vector<2x256xf32>
    %10 = vector.broadcast %6 : vector<2x1xf32> to vector<2x256xf32>
    %11 = arith.subf %9, %10 : vector<2x256xf32>
    %12 = arith.mulf %11, %11 : vector<2x256xf32>
    %cst_8 = arith.constant dense<0.000000e+00> : vector<2xf32>
    %13 = vector.multi_reduction <add>, %12, %cst_8 [1] : vector<2x256xf32> to vector<2xf32>
    %14 = vector.shape_cast %13 : vector<2xf32> to vector<2x1xf32>
    %cst_9 = arith.constant 3.906250e-03 : f32
    %15 = vector.broadcast %cst_9 : f32 to vector<2x1xf32>
    %16 = arith.mulf %14, %15 : vector<2x1xf32>
    %cst_10 = arith.constant 9.99999974E-6 : f32
    %17 = vector.broadcast %cst_10 : f32 to vector<2x1xf32>
    %18 = arith.addf %16, %17 : vector<2x1xf32>
    %19 = math.rsqrt %18 : vector<2x1xf32>
    %c0_11 = arith.constant 0 : index
    %c0_12 = arith.constant 0 : index
    %20 = vector.load %arg3[%c0_11, %c0_12] : memref<1x256xf32, #tpu.memory_space<vmem>>, vector<1x256xf32>
    %c0_13 = arith.constant 0 : index
    %c0_14 = arith.constant 0 : index
    %21 = vector.load %arg4[%c0_13, %c0_14] : memref<1x256xf32, #tpu.memory_space<vmem>>, vector<1x256xf32>
    %c0_15 = arith.constant 0 : index
    %c0_16 = arith.constant 0 : index
    %22 = vector.load %arg1[%c0_15, %c0_16] : memref<2x256xf32, #tpu.memory_space<vmem>>, vector<2x256xf32>
    %c0_17 = arith.constant 0 : index
    %c0_18 = arith.constant 0 : index
    %23 = vector.load %arg2[%c0_17, %c0_18] : memref<2x256xf32, #tpu.memory_space<vmem>>, vector<2x256xf32>
    %24 = arith.addf %22, %23 : vector<2x256xf32>
    %25 = vector.broadcast %6 : vector<2x1xf32> to vector<2x256xf32>
    %26 = arith.subf %24, %25 : vector<2x256xf32>
    %27 = vector.broadcast %19 : vector<2x1xf32> to vector<2x256xf32>
    %28 = arith.mulf %26, %27 : vector<2x256xf32>
    %29 = vector.broadcast %20 : vector<1x256xf32> to vector<2x256xf32>
    %30 = arith.mulf %28, %29 : vector<2x256xf32>
    %31 = vector.broadcast %21 : vector<1x256xf32> to vector<2x256xf32>
    %32 = arith.addf %30, %31 : vector<2x256xf32>
    %c0_19 = arith.constant 0 : index
    %c0_20 = arith.constant 0 : index
    %33 = vector.load %arg5[%c0_19, %c0_20] : memref<2x256xf32, #tpu.memory_space<vmem>>, vector<2x256xf32>
    tpu.vector_store %arg5[%c0_19, %c0_20], %32 {strides = array<i32>} : memref<2x256xf32, #tpu.memory_space<vmem>>, vector<2x256xf32>,
    return
  }
  func.func @transform_0(%arg0: i32) -> (i32, i32) {
    %c0_i32 = arith.constant 0 : i32
    %c0_i32_0 = arith.constant 0 : i32
    return %arg0, %c0_i32 : i32, i32
  }
  func.func @transform_1(%arg0: i32) -> (i32, i32) {
    %c0_i32 = arith.constant 0 : i32
    %c0_i32_0 = arith.constant 0 : i32
    return %arg0, %c0_i32 : i32, i32
  }
  func.func @transform_2(%arg0: i32) -> (i32, i32) {
    %c0_i32 = arith.constant 0 : i32
    %c0_i32_0 = arith.constant 0 : i32
    %c0_i32_1 = arith.constant 0 : i32
    return %c0_i32, %c0_i32_0 : i32, i32
  }
  func.func @transform_3(%arg0: i32) -> (i32, i32) {
    %c0_i32 = arith.constant 0 : i32
    %c0_i32_0 = arith.constant 0 : i32
    %c0_i32_1 = arith.constant 0 : i32
    return %c0_i32, %c0_i32_0 : i32, i32
  }
  func.func @transform_4(%arg0: i32) -> (i32, i32) {
    %c0_i32 = arith.constant 0 : i32
    %c0_i32_0 = arith.constant 0 : i32
    return %arg0, %c0_i32 : i32, i32
  }
}

</mosaic_0001>

<bundles_post_ra>
// kernel: tpu_custom_call.1
= control target key start
LH: loop header
LB: loop body
LE: loop exit
PB: predicated region body
PF: predicated region fallthrough
CT: control target
= control target key end

     0   :  { %9 = vsyncpa [#allocation3], 0  ;;  %s282_s0 = inlined_call_operand.hbm [shape: f32[2,256], index: 0, kind: input, shape index: {}]   ;;  %s283_s1 = inlined_call_operand.hbm [shape: f32[2,256], index: 1, kind: input, shape index: {}]   ;;  %s284_s2 = inlined_call_operand.vmem [shape: f32[1,256], index: 2, kind: input, shape index: {}]   ;;  %s285_s3 = inlined_call_operand.vmem [shape: f32[1,256], index: 3, kind: input, shape index: {}]   ;;  %s286_s4 = inlined_call_operand.hbm [shape: f32[2,256], index: 4, kind: output, shape index: {}]  }
   0x1   :  { %10 = vsyncpa [#allocation6], 0 }
   0x2   :  { %11 = vsyncpa [#allocation4], 0  ;;  %s233_s15 = smov [#allocation2]   ;;  %s234_s17 = smov [#allocation5]  }
   0x3   :  { %s18_s16 = sshll.u32 %s233_s15, 4  ;;  %s28_s18 = sshll.u32 %s234_s17, 4  ;;  %s19_s16 = int_to_ptr.vmem [resolvable:$true] %s18_s16  ;;  %s29_s18 = int_to_ptr.vmem [resolvable:$true] %s28_s18 }
   0x4   :  { %s175_s19 = scalar_lea.vmem %s19_s16, 64  ;;  %p180_p1 = scmp.lt.s32.totalorder %s19_s16, %s19_s16 }
   0x5   :  { %p176_p0 = scmp.ne.s32.totalorder %s19_s16, %s175_s19  ;;  %p181_p2 = scmp.lt.s32.totalorder %s175_s19, %s175_s19 }
   0x7   :  { %p182_p3 = por %p181_p2, %p180_p1 }
   0x9   :  { %p183_p4 = pnand %p182_p3, %p176_p0 }
   0xb   :  { %186 = shalt.err (!%p183_p4)
}
   0xc   :  { %21 = dma.hbm_to_vmem [thread:$0]  %s282_s0, 64, %s19_s16, [#allocation3]  }
   0xd   :  { %s195_s22 = scalar_lea.vmem %s29_s18, 64  ;;  %p200_p6 = scmp.lt.s32.totalorder %s29_s18, %s29_s18 }
   0xe   :  { %p196_p5 = scmp.ne.s32.totalorder %s29_s18, %s195_s22  ;;  %p201_p7 = scmp.lt.s32.totalorder %s195_s22, %s195_s22 }
  0x10   :  { %p202_p8 = por %p201_p7, %p200_p6 }
  0x12   :  { %p203_p9 = pnand %p202_p8, %p196_p5 }
  0x14   :  { %206 = shalt.err (!%p203_p9)
}
  0x15   :  { %31 = dma.hbm_to_vmem [thread:$0]  %s283_s1, 64, %s29_s18, [#allocation6]  }
  0x16   :  { %227 = dma.done.wait [#allocation3], 64  }
  0x17   :  { %228 = vsyncadd [#allocation3], 4294967232 }
  0x18   :  { %229 = dma.done.wait [#allocation6], 64  }
  0x19   :  { %230 = vsyncadd [#allocation6], 4294967232  ;;  %v49_v0 = vlaneseq  ;;  %v235_v1 = vmov 1983009808   ;;  %v42_v6 = vld [vmem:[#allocation2] sm:$0xf] }
  0x1a   :  { %v47_v2 = vunpack.c.l.s4 %v235_v1  ;;  %v43_v7 = vld [vmem:[#allocation5] sm:$0xf]  ;;  %vm56_vm0 = vcmask 1041408   ;;  %v236_v14 = vmov 269488144   ;;  %s237_s27 = smov [#allocation7]  }
  0x1b   :  { %v50_v3 = vshrl.u32 %v49_v0, 7  ;;  %v44_v8 = vadd.f32 %v43_v7, %v42_v6  ;;  %v65_v15 = vunpack.c.l.s4 %v236_v14  ;;  %v93_v33 = vld [vmem:[%s284_s2] sm:$0x3]  ;;  %s150_s28 = sshll.u32 %s237_s27, 4  ;;  %s151_s28 = int_to_ptr.vmem [resolvable:$true] %s150_s28 }
  0x1c   :  { %v48_v4 = vunpack.c.0.s8 %v47_v2  ;;  %v94_v34 = vld [vmem:[%s285_s3] sm:$0x3]  ;;  %s207_s2 = scalar_lea.vmem %s151_s28, 64  ;;  %p212_p11 = scmp.lt.s32.totalorder %s151_s28, %s151_s28 }
  0x1d   :  { %v66_v16 = vunpack.c.0.s8 %v65_v15  ;;  %v108_v31 = vsub.s32 0, %v50_v3  ;;  %v112_v32 = vsub.s32 1, %v50_v3  ;;  %p208_p10 = scmp.ne.s32.totalorder %s151_s28, %s207_s2  ;;  %p213_p12 = scmp.lt.s32.totalorder %s207_s2, %s207_s2 }
  0x1e   :  { %v51_v5 = vsub.s32 %v48_v4, %v50_v3 }
  0x1f   :  { %v69_v17 = vsub.s32 %v66_v16, %v50_v3  ;;  %v109_v35 = vrot.slane %v93_v33, %v108_v31  ;;  %v113_v36 = vrot.slane %v93_v33, %v112_v32  ;;  %v128_v37 = vrot.slane %v94_v34, %v108_v31  ;;  %p214_p13 = por %p213_p12, %p212_p11 }
  0x20   :  { %v52_v9 = vrot.slane %v44_v8, %v51_v5  ;;  %v132_v38 = vrot.slane %v94_v34, %v112_v32 }
  0x21   :  { %v114_v39 = vcombine.low %v109_v35, %v113_v36  ;;  %p215_p0 = pnand %p214_p13, %p208_p10 }
  0x22   :  { %v53_v10 = vcombine.high %v52_v9, %v52_v9  ;;  %v57_v11 = vsel %vm56_vm0, %v52_v9, 0.0  ;;  %v133_v40 = vcombine.low %v128_v37, %v132_v38 }
  0x23   :  { %v121_v43 = vrot.slane %v114_v39, %v51_v5 }
  0x24   :  { %v58_v12 = vsel %vm56_vm0, %v53_v10, 0.0  ;;  %v140_v45 = vrot.slane %v133_v40, %v51_v5 }
  0x25   :  { %v59_v13 = vadd.f32 %v58_v12, %v57_v11 }
  0x27   :  { %60 = vadd.xlane.f32.xlu0 %v59_v13 }
  0xb0   :  { %v61_v18 = vpop.xlane.xlu0 %60 }
  0xb1   :  { %v62_v19 = vmul.f32 0.00390625, %v61_v18 }
  0xb3   :  { %v70_v20 = vrot.slane %v62_v19, %v69_v17 }
  0xb5   :  { %v72_v21 = vsub.f32 %v44_v8, %v70_v20 }
  0xb7   :  { %v73_v22 = vmul.f32 %v72_v21, %v72_v21 }
  0xb9   :  { %v81_v23 = vrot.slane %v73_v22, %v51_v5 }
  0xbb   :  { %v82_v24 = vcombine.high %v81_v23, %v81_v23  ;;  %v85_v25 = vsel %vm56_vm0, %v81_v23, 0.0 }
  0xbd   :  { %v86_v26 = vsel %vm56_vm0, %v82_v24, 0.0 }
  0xbe   :  { %v87_v27 = vadd.f32 %v86_v26, %v85_v25 }
  0xc0   :  { %88 = vadd.xlane.f32.xlu0 %v87_v27 }
 0x149   :  { %v89_v28 = vpop.xlane.xlu0 %88 }
 0x14a   :  { %v90_v29 = vmul.f32 0.00390625, %v89_v28 }
 0x14c   :  { %v91_v30 = vadd.f32 1e-05, %v90_v29 }
 0x14e   :  { %165 = vrsqrt.f32 %v91_v30 }
 0x15b   :  { %v166_v41 = vpop.eup %165 }
 0x15c   :  { %v102_v42 = vrot.slane %v166_v41, %v69_v17 }
 0x15e   :  { %v104_v44 = vmul.f32 %v102_v42, %v72_v21 }
 0x160   :  { %v123_v46 = vmul.f32 %v121_v43, %v104_v44 }
 0x162   :  { %v142_v47 = vadd.f32 %v140_v45, %v123_v46 }
 0x164   :  { %143 = vst [vmem:[#allocation7] sm:$0xf] %v142_v47 }
 0x165   :  { %218 = shalt.err (!%p215_p0)
}
 0x166   :  { %153 = dma.vmem_to_hbm [thread:$0]  %s151_s28, 64, %s286_s4, [#allocation4]  }
 0x167   :  { %231 = dma.done.wait [#allocation4], 64  }
 0x168   :  { %232 = vsyncadd [#allocation4], 4294967232 }
 0x169   :  { %157 = vsyncpa [#allocation3], 1 }
 0x16a   :  { %158 = vsyncpa [#allocation6], 1 }
 0x16b   :  { %159 = vsyncpa [#allocation4], 1 }

</bundles_post_ra>
